<compile_context>
chip_gen: v5e
topology: v5e:2x2
jax: 0.10.0
libtpu: 0.0.40
codegen_flags: <defaults>
</compile_context>

<pallas_src>
import functools

import jax
import jax.numpy as jnp
from jax import lax
from jax.experimental import pallas as pl
from jax.experimental.pallas import tpu as pltpu


def actor_mlp_kernel(x_ref, w1_ref, b1_ref, w2_ref, b2_ref, w3t_ref, b3t_ref,
                     out_ref):
    """Fused relu(fc1) -> relu(fc2) -> tanh(fc3) for one batch tile.

    x_ref:   (bm, S)   bf16
    w1_ref:  (S, F1)   bf16   b1_ref:  (1, F1) f32
    w2_ref:  (F1, F2)  bf16   b2_ref:  (1, F2) f32
    w3t_ref: (A8, F2)  bf16   b3t_ref: (A8, 1) f32  (A8 = action_size rounded
                              up to 8; padded rows are zero)
    out_ref: (A8, bm)  f32    transposed output, lane-dense along batch
    """
    # fc1 + relu: bf16 MXU inputs, f32 accumulation / elementwise.
    h1 = jnp.dot(x_ref[...], w1_ref[...], preferred_element_type=jnp.float32)
    h1 = jnp.maximum(h1 + b1_ref[...], 0.0)

    # fc2 + relu
    h2 = jnp.dot(h1.astype(jnp.bfloat16), w2_ref[...],
                 preferred_element_type=jnp.float32)
    h2 = jnp.maximum(h2 + b2_ref[...], 0.0)

    # fc3 directly in transposed orientation:
    #   (A8, F2) . (bm, F2)^T -> (A8, bm)   (trans-B dot_general on the MXU)
    h3t = lax.dot_general(w3t_ref[...], h2.astype(jnp.bfloat16),
                          dimension_numbers=(((1,), (1,)), ((), ())),
                          preferred_element_type=jnp.float32)
    out_ref[...] = jnp.tanh(h3t + b3t_ref[...]).astype(out_ref.dtype)


def _round_up(x, m):
    return ((x + m - 1) // m) * m


def _cdiv(a, b):
    return (a + b - 1) // b


def _choose_tiling(batch, block_m):
    """Balanced batch tiles; >=2 tiles for big batches (v7x has 2 TCs)."""
    block_m = max(128, block_m)
    n_tiles = _cdiv(batch, block_m)
    if n_tiles == 1 and batch >= 512:
        n_tiles = 2  # keep both v7x TensorCores busy on the "parallel" axis
    if n_tiles == 1:
        bm = _round_up(batch, 8)   # block == full array: no 128-lane constraint
    else:
        # multi-tile: the transposed output's lane dim is bm -> multiple of 128
        bm = _round_up(_cdiv(batch, n_tiles), 128)
    return bm, n_tiles * bm


@functools.partial(jax.jit, static_argnames=("action_size", "block_m"))
def actor_forward(x, w1, b1, w2, b2, w3t, b3t, *, action_size, block_m=1024):
    batch, state_size = x.shape
    fc1_units = w1.shape[1]
    fc2_units = w2.shape[1]
    a8 = w3t.shape[0]  # action_size rounded up to 8 (pre-padded)

    bm, padded_batch = _choose_tiling(batch, block_m)

    # bf16 matmul inputs (no-op if the caller already feeds bf16 activations).
    xb = x.astype(jnp.bfloat16)
    if padded_batch != batch:
        xb = jnp.pad(xb, ((0, padded_batch - batch), (0, 0)))

    grid = (padded_batch // bm,)

    flops = 2 * padded_batch * (
        state_size * fc1_units + fc1_units * fc2_units + fc2_units * a8)
    transcendentals = padded_batch * a8  # tanh
    bytes_accessed = (
        2 * padded_batch * state_size                        # x (bf16)
        + 2 * (state_size * fc1_units + fc1_units * fc2_units
               + a8 * fc2_units)                             # weights (bf16)
        + 4 * (fc1_units + fc2_units + a8)                   # biases (f32)
        + 4 * a8 * padded_batch)                             # out (f32)

    out_t = pl.pallas_call(
        actor_mlp_kernel,
        out_shape=jax.ShapeDtypeStruct((a8, padded_batch), jnp.float32),
        grid=grid,
        in_specs=[
            # x: moves per batch tile
            pl.BlockSpec((bm, state_size), lambda i: (i, 0)),
            # weights / biases: constant index_map -> loaded once, VMEM-resident
            pl.BlockSpec(w1.shape, lambda i: (0, 0)),
            pl.BlockSpec(b1.shape, lambda i: (0, 0)),
            pl.BlockSpec(w2.shape, lambda i: (0, 0)),
            pl.BlockSpec(b2.shape, lambda i: (0, 0)),
            pl.BlockSpec(w3t.shape, lambda i: (0, 0)),
            pl.BlockSpec(b3t.shape, lambda i: (0, 0)),
        ],
        out_specs=pl.BlockSpec((a8, bm), lambda i: (0, i)),
        compiler_params=pltpu.CompilerParams(
            dimension_semantics=("parallel",)),
        cost_estimate=pl.CostEstimate(
            flops=flops,
            transcendentals=transcendentals,
            bytes_accessed=bytes_accessed),
    )(xb, w1, b1, w2, b2, w3t, b3t)

    # (A8, padded_batch) -> (batch, action_size): tiny XLA slice + transpose.
    return out_t[:action_size, :batch].T


def init_actor_params(key, state_size, action_size,
                      fc1_units=128, fc2_units=128):
    """Deterministic init mirroring ModuleActor.reset_parameters().

    func_hidden_init in the PyTorch spec uses weight.size()[0], which for
    nn.Linear is out_features, so the hidden limits are 1/sqrt(fc_units) —
    we replicate the spec, not the textbook fan_in rule.
    """
    k1, k2, k3, kb1, kb2, kb3 = jax.random.split(key, 6)

    lim1 = 1.0 / jnp.sqrt(jnp.float32(fc1_units))
    lim2 = 1.0 / jnp.sqrt(jnp.float32(fc2_units))
    lim3 = 0.003

    # Weights stored (in, out): transpose of torch's (out, in); same math.
    w1 = jax.random.uniform(k1, (state_size, fc1_units), jnp.float32,
                            minval=-lim1, maxval=lim1)
    w2 = jax.random.uniform(k2, (fc1_units, fc2_units), jnp.float32,
                            minval=-lim2, maxval=lim2)
    w3 = jax.random.uniform(k3, (fc2_units, action_size), jnp.float32,
                            minval=-lim3, maxval=lim3)

    # Biases: PyTorch Linear default init U(-1/sqrt(fan_in), 1/sqrt(fan_in))
    # (reset_parameters only touches the weights).
    bl1 = 1.0 / jnp.sqrt(jnp.float32(state_size))
    bl2 = 1.0 / jnp.sqrt(jnp.float32(fc1_units))
    bl3 = 1.0 / jnp.sqrt(jnp.float32(fc2_units))
    b1 = jax.random.uniform(kb1, (1, fc1_units), jnp.float32, -bl1, bl1)
    b2 = jax.random.uniform(kb2, (1, fc2_units), jnp.float32, -bl2, bl2)
    b3 = jax.random.uniform(kb3, (1, action_size), jnp.float32, -bl3, bl3)

    return w1, b1, w2, b2, w3, b3


def prepare_actor_params(params):
    """One-time prep: cast matmul weights to bf16, pre-pad & transpose fc3."""
    w1, b1, w2, b2, w3, b3 = params
    fc2_units, action_size = w3.shape
    a8 = _round_up(action_size, 8)
    w3t = jnp.zeros((a8, fc2_units), jnp.float32).at[:action_size, :].set(w3.T)
    b3t = jnp.zeros((a8, 1), jnp.float32).at[:action_size, 0].set(b3[0])
    return (w1.astype(jnp.bfloat16), b1,
            w2.astype(jnp.bfloat16), b2,
            w3t.astype(jnp.bfloat16), b3t)


def _reference_f32(x, params):
    w1, b1, w2, b2, w3, b3 = params
    h = jnp.maximum(x @ w1 + b1, 0.0)
    h = jnp.maximum(h @ w2 + b2, 0.0)
    return jnp.tanh(h @ w3 + b3)


def _reference_bf16(x, params):
    """Same math with bf16 matmul inputs / f32 accumulation (kernel-matched)."""
    w1, b1, w2, b2, w3, b3 = params
    bf = jnp.bfloat16
    h = jnp.dot(x.astype(bf), w1.astype(bf), preferred_element_type=jnp.float32)
    h = jnp.maximum(h + b1, 0.0)
    h = jnp.dot(h.astype(bf), w2.astype(bf), preferred_element_type=jnp.float32)
    h = jnp.maximum(h + b2, 0.0)
    h = jnp.dot(h.astype(bf), w3.astype(bf), preferred_element_type=jnp.float32)
    return jnp.tanh(h + b3)


if __name__ == "__main__":
    key = jax.random.PRNGKey(0)
    k_params, k1, k2, k3 = jax.random.split(key, 4)

    state_size = 32
    action_size = 4      # non-multiple-of-8: exercises fc3 row padding
    fc1_units = 128
    fc2_units = 128

    raw = init_actor_params(k_params, state_size, action_size,
                            fc1_units, fc2_units)
    prepped = prepare_actor_params(raw)

    # batch=8: single tiny tile; batch=300: single balanced ragged tile
    # (304 rows, ~1% padding); batch=640: two balanced 384-row tiles
    # (resident weights across grid steps + the >=2-tile rule for v7x).
    for batch, kx in ((8, k1), (300, k2), (640, k3)):
        x = jax.random.normal(kx, (batch, state_size), jnp.float32)
        out = jax.block_until_ready(
            actor_forward(x, *prepped, action_size=action_size))
        assert out.shape == (batch, action_size)

        ref16 = _reference_bf16(x, raw)   # kernel-matched precision
        ref32 = _reference_f32(x, raw)    # full-f32 semantics of the module
        assert jnp.allclose(out, ref16, atol=1e-4, rtol=1e-4), batch
        assert jnp.allclose(out, ref32, atol=2e-2, rtol=2e-2), batch

    print("KERNEL_OK")
</pallas_src>

<mosaic_0001>
module attributes {stable_mosaic.version = 11 : i64} {
  func.func @actor_mlp_kernel(%arg0: i32, %arg1: memref<8x32xbf16, #tpu.memory_space<vmem>>, %arg2: memref<32x128xbf16, #tpu.memory_space<vmem>>, %arg3: memref<1x128xf32, #tpu.memory_space<vmem>>, %arg4: memref<128x128xbf16, #tpu.memory_space<vmem>>, %arg5: memref<1x128xf32, #tpu.memory_space<vmem>>, %arg6: memref<8x128xbf16, #tpu.memory_space<vmem>>, %arg7: memref<8x1xf32, #tpu.memory_space<vmem>>, %arg8: memref<8x8xf32, #tpu.memory_space<vmem>>) attributes {dimension_semantics = [#tpu.dimension_semantics<parallel>], iteration_bounds = array<i64: 1>, scalar_prefetch = 0 : i64, scratch_operands = 0 : i64, tpu.core_type = #tpu.core_type<tc>, window_params = [{transform_indices = @transform_0, window_bounds = array<i64: 8, 32>}, {pipeline_mode = #tpu.pipeline_mode<synchronous>, transform_indices = @transform_1, window_bounds = array<i64: 32, 128>}, {pipeline_mode = #tpu.pipeline_mode<synchronous>, transform_indices = @transform_2, window_bounds = array<i64: 1, 128>}, {pipeline_mode = #tpu.pipeline_mode<synchronous>, transform_indices = @transform_3, window_bounds = array<i64: 128, 128>}, {pipeline_mode = #tpu.pipeline_mode<synchronous>, transform_indices = @transform_4, window_bounds = array<i64: 1, 128>}, {pipeline_mode = #tpu.pipeline_mode<synchronous>, transform_indices = @transform_5, window_bounds = array<i64: 8, 128>}, {pipeline_mode = #tpu.pipeline_mode<synchronous>, transform_indices = @transform_6, window_bounds = array<i64: 8, 1>}, {transform_indices = @transform_7, window_bounds = array<i64: 8, 8>}]} {
    %c0 = arith.constant 0 : index
    %c0_0 = arith.constant 0 : index
    %0 = vector.load %arg1[%c0, %c0_0] : memref<8x32xbf16, #tpu.memory_space<vmem>>, vector<8x32xbf16>
    %c0_1 = arith.constant 0 : index
    %c0_2 = arith.constant 0 : index
    %1 = vector.load %arg2[%c0_1, %c0_2] : memref<32x128xbf16, #tpu.memory_space<vmem>>, vector<32x128xbf16>
    %cst = arith.constant dense<0.000000e+00> : vector<8x128xf32>
    %2 = tpu.matmul %0, %1, %cst {dimension_numbers = #tpu.dot_dimension_numbers<[1], [0], [0], [1], [0, 0, 1, 1], [], []>} : vector<8x32xbf16>, vector<32x128xbf16>, vector<8x128xf32> -> vector<8x128xf32>
    %c0_3 = arith.constant 0 : index
    %c0_4 = arith.constant 0 : index
    %3 = vector.load %arg3[%c0_3, %c0_4] : memref<1x128xf32, #tpu.memory_space<vmem>>, vector<1x128xf32>
    %4 = vector.broadcast %3 : vector<1x128xf32> to vector<8x128xf32>
    %5 = arith.addf %2, %4 : vector<8x128xf32>
    %cst_5 = arith.constant 0.000000e+00 : f32
    %6 = vector.broadcast %cst_5 : f32 to vector<8x128xf32>
    %7 = arith.maximumf %5, %6 : vector<8x128xf32>
    %8 = arith.truncf %7 : vector<8x128xf32> to vector<8x128xbf16>
    %c0_6 = arith.constant 0 : index
    %c0_7 = arith.constant 0 : index
    %9 = vector.load %arg4[%c0_6, %c0_7] : memref<128x128xbf16, #tpu.memory_space<vmem>>, vector<128x128xbf16>
    %cst_8 = arith.constant dense<0.000000e+00> : vector<8x128xf32>
    %10 = tpu.matmul %8, %9, %cst_8 {dimension_numbers = #tpu.dot_dimension_numbers<[1], [0], [0], [1], [0, 0, 1, 1], [], []>} : vector<8x128xbf16>, vector<128x128xbf16>, vector<8x128xf32> -> vector<8x128xf32>
    %c0_9 = arith.constant 0 : index
    %c0_10 = arith.constant 0 : index
    %11 = vector.load %arg5[%c0_9, %c0_10] : memref<1x128xf32, #tpu.memory_space<vmem>>, vector<1x128xf32>
    %12 = vector.broadcast %11 : vector<1x128xf32> to vector<8x128xf32>
    %13 = arith.addf %10, %12 : vector<8x128xf32>
    %cst_11 = arith.constant 0.000000e+00 : f32
    %14 = vector.broadcast %cst_11 : f32 to vector<8x128xf32>
    %15 = arith.maximumf %13, %14 : vector<8x128xf32>
    %c0_12 = arith.constant 0 : index
    %c0_13 = arith.constant 0 : index
    %16 = vector.load %arg6[%c0_12, %c0_13] : memref<8x128xbf16, #tpu.memory_space<vmem>>, vector<8x128xbf16>
    %17 = arith.truncf %15 : vector<8x128xf32> to vector<8x128xbf16>
    %cst_14 = arith.constant dense<0.000000e+00> : vector<8x8xf32>
    %18 = tpu.matmul %16, %17, %cst_14 {dimension_numbers = #tpu.dot_dimension_numbers<[1], [1], [0], [0], [0, 0, 1, 0], [], []>} : vector<8x128xbf16>, vector<8x128xbf16>, vector<8x8xf32> -> vector<8x8xf32>
    %c0_15 = arith.constant 0 : index
    %c0_16 = arith.constant 0 : index
    %19 = vector.load %arg7[%c0_15, %c0_16] : memref<8x1xf32, #tpu.memory_space<vmem>>, vector<8x1xf32>
    %20 = vector.broadcast %19 : vector<8x1xf32> to vector<8x8xf32>
    %21 = arith.addf %18, %20 : vector<8x8xf32>
    %22 = math.tanh %21 : vector<8x8xf32>
    %c0_17 = arith.constant 0 : index
    %c0_18 = arith.constant 0 : index
    %23 = vector.load %arg8[%c0_17, %c0_18] : memref<8x8xf32, #tpu.memory_space<vmem>>, vector<8x8xf32>
    tpu.vector_store %arg8[%c0_17, %c0_18], %22 {strides = array<i32>} : memref<8x8xf32, #tpu.memory_space<vmem>>, vector<8x8xf32>,
    return
  }
  func.func @transform_0(%arg0: i32) -> (i32, i32) {
    %c0_i32 = arith.constant 0 : i32
    %c0_i32_0 = arith.constant 0 : i32
    return %arg0, %c0_i32 : i32, i32
  }
  func.func @transform_1(%arg0: i32) -> (i32, i32) {
    %c0_i32 = arith.constant 0 : i32
    %c0_i32_0 = arith.constant 0 : i32
    %c0_i32_1 = arith.constant 0 : i32
    return %c0_i32, %c0_i32_0 : i32, i32
  }
  func.func @transform_2(%arg0: i32) -> (i32, i32) {
    %c0_i32 = arith.constant 0 : i32
    %c0_i32_0 = arith.constant 0 : i32
    %c0_i32_1 = arith.constant 0 : i32
    return %c0_i32, %c0_i32_0 : i32, i32
  }
  func.func @transform_3(%arg0: i32) -> (i32, i32) {
    %c0_i32 = arith.constant 0 : i32
    %c0_i32_0 = arith.constant 0 : i32
    %c0_i32_1 = arith.constant 0 : i32
    return %c0_i32, %c0_i32_0 : i32, i32
  }
  func.func @transform_4(%arg0: i32) -> (i32, i32) {
    %c0_i32 = arith.constant 0 : i32
    %c0_i32_0 = arith.constant 0 : i32
    %c0_i32_1 = arith.constant 0 : i32
    return %c0_i32, %c0_i32_0 : i32, i32
  }
  func.func @transform_5(%arg0: i32) -> (i32, i32) {
    %c0_i32 = arith.constant 0 : i32
    %c0_i32_0 = arith.constant 0 : i32
    %c0_i32_1 = arith.constant 0 : i32
    return %c0_i32, %c0_i32_0 : i32, i32
  }
  func.func @transform_6(%arg0: i32) -> (i32, i32) {
    %c0_i32 = arith.constant 0 : i32
    %c0_i32_0 = arith.constant 0 : i32
    %c0_i32_1 = arith.constant 0 : i32
    return %c0_i32, %c0_i32_0 : i32, i32
  }
  func.func @transform_7(%arg0: i32) -> (i32, i32) {
    %c0_i32 = arith.constant 0 : i32
    %c0_i32_0 = arith.constant 0 : i32
    return %c0_i32, %arg0 : i32, i32
  }
}

</mosaic_0001>

<bundles_post_ra>
// kernel: actor_forward.1
= control target key start
LH: loop header
LB: loop body
LE: loop exit
PB: predicated region body
PF: predicated region fallthrough
CT: control target
= control target key end

     0   :  { %12 = vsyncpa [#allocation3], 0  ;;  %s280_s27 = smov [#allocation2]   ;;  %s281_s29 = smov 64   ;;  %s351_s0 = inlined_call_operand.vmem [shape: bf16[8,32], index: 0, kind: input, shape index: {}]   ;;  %s352_s1 = inlined_call_operand.vmem [shape: bf16[32,128], index: 1, kind: input, shape index: {}]   ;;  %s353_s2 = inlined_call_operand.vmem [shape: f32[1,128], index: 2, kind: input, shape index: {}]   ;;  %s354_s3 = inlined_call_operand.hbm [shape: bf16[128,128], index: 3, kind: input, shape index: {}]   ;;  %s355_s4 = inlined_call_operand.vmem [shape: f32[1,128], index: 4, kind: input, shape index: {}]   ;;  %s356_s5 = inlined_call_operand.vmem [shape: bf16[8,128], index: 5, kind: input, shape index: {}]   ;;  %s357_s6 = inlined_call_operand.vmem [shape: f32[8,1], index: 6, kind: input, shape index: {}]   ;;  %s358_s7 = inlined_call_operand.vmem [shape: f32[8,8], index: 7, kind: output, shape index: {}]  }
   0x1   :  { %s23_s26 = sshll.u32 %s354_s3, 4  ;;  %s25_s28 = sshll.u32 %s280_s27, 4  ;;  %s24_s26 = int_to_ptr.hbm [resolvable:$true] %s23_s26  ;;  %s26_s28 = int_to_ptr.vmem [resolvable:$true] %s25_s28 }
   0x2   :  { %s282_s30 = smov 4  }
   0x3   :  { %31 = dma.hbm_to_vmem [thread:$0]  %s24_s26, 1024, %s26_s28, [#allocation3], %s281_s29, %s281_s29, %s282_s30  }
   0x4   :  { %278 = dma.done.wait [#allocation3], 1024  }
   0x5   :  { %279 = vsyncadd [#allocation3], 4294966272  ;;  %v236_v0 = vld [vmem:[%s352_s1 + $0x8] sm:$0xff]  ;;  %v244_v1 = vld [vmem:[#allocation2 + $0x38] sm:$0xff]  ;;  %vm64_vm0 = vcmask 261120   ;;  %v283_v18 = vmov 0  }
   0x6   :  { %74 = vmatpush.bf16.msra.mxu0 %v236_v0  ;;  %v235_v2 = vld [vmem:[%s352_s1] sm:$0xff]  ;;  %151 = vmatpush.bf16.msra.mxu1 %v244_v1  ;;  %v243_v3 = vld [vmem:[#allocation2 + $0x30] sm:$0xff]  ;;  %v242_v5 = vld [vmem:[#allocation2 + $0x28] sm:$0xff]  ;;  %vm187_vm1 = vcmask 64512  }
   0x7   :  { %v43_v4 = vld [vmem:[%s351_s0] sm:$0xf]  ;;  %v240_v7 = vld [vmem:[#allocation2 + $0x18] sm:$0xff]  ;;  %v239_v8 = vld [vmem:[#allocation2 + $0x10] sm:$0xff]  ;;  %249 = vset.pattern.permute.xlu0 %v283_v18 }
   0x8   :  { %v241_v6 = vld [vmem:[#allocation2 + $0x20] sm:$0xff]  ;;  %v238_v9 = vld [vmem:[#allocation2 + $0x8] sm:$0xff] }
   0x9   :  { %v237_v10 = vld [vmem:[#allocation2] sm:$0xff] }
   0xa   :  { %75 = vmatpush.bf16.msra.mxu0 %v235_v2  ;;  %152 = vmatpush.bf16.msra.mxu1 %v243_v3  ;;  %v250_v11 = vld [vmem:[%s353_s2] ss:$0 sm:$0xff] }
   0xb   :  { %v167_v17 = vld [vmem:[%s357_s6] sm:$0xff] }
   0xc   :  { %170 = vperm.xlu0 %249, %v167_v17   ;;  %v251_v19 = vld [vmem:[%s355_s4] ss:$0 sm:$0xff] }
   0xd   :  { %202 = vmatmul.msk.bf16.vlgmr.msra.gmra.mxu0 %vm64_vm0, %v43_v4  ;;  %v165_v25 = vld [vmem:[%s356_s5] sm:$0xf] }
   0xe   :  { %153 = vmatpush.bf16.msra.mxu1 %v242_v5 }
  0x12   :  { %154 = vmatpush.bf16.msra.mxu1 %v241_v6 }
  0x16   :  { %155 = vmatpush.bf16.msra.mxu1 %v240_v7 }
  0x1a   :  { %156 = vmatpush.bf16.msra.mxu1 %v239_v8 }
  0x1e   :  { %157 = vmatpush.bf16.msra.mxu1 %v238_v9 }
  0x22   :  { %158 = vmatpush.bf16.msra.mxu1 %v237_v10 }
  0x7e   :  { %v171_v26 = vpop.permute.xlu0 %170 }
  0x8a   :  { %v77_v12 = vpop.f32.mrf.mxu0 }
  0x8b   :  { %v78_v13 = vadd.f32 %v250_v11, %v77_v12 }
  0x8d   :  { %v81_v14 = vmax.f32 %v78_v13, 0.0 }
  0x8f   :  { %v82_v15 = vpack.c.bf16 %v81_v14, %v81_v14 }
  0x91   :  { %159 = vmatmul.bf16.vlgmr.msra.gmra.mxu1 %v82_v15 }
  0x92   :  { %v79_v16 = vpop.f32.mrf.mxu0 }
 0x10e   :  { %v160_v20 = vpop.f32.mrf.mxu1 }
 0x10f   :  { %v161_v21 = vadd.f32 %v251_v19, %v160_v20 }
 0x111   :  { %v164_v22 = vmax.f32 %v161_v21, 0.0 }
 0x113   :  { %v166_v23 = vpack.c.bf16 %v164_v22, %v164_v22 }
 0x115   :  { %180 = vmatpush.bf16.xpose.msra.mxu2 %v166_v23 }
 0x116   :  { %v162_v24 = vpop.f32.mrf.mxu1 }
 0x11c   :  { %181 = vmatmul.bf16.vlgmr.msra.gmra.mxu2 %v165_v25 }
 0x19f   :  { %v182_v27 = vpop.f32.mrf.mxu2 }
 0x1a0   :  { %v183_v28 = vadd.f32 %v182_v27, %v171_v26 }
 0x1a2   :  { %252 = vtanh.f32 %v183_v28 }
 0x1a7   :  { %v184_v29 = vpop.f32.mrf.mxu2 }
 0x1a8   :  { %v253_v30 = vpop.eup %252 }
 0x1a9   :  { %188 = vst.msk [vmem:[%s358_s7] sm:$0xff] %vm187_vm1, %v253_v30 }
 0x1aa   :  { %193 = vsyncpa [#allocation3], 1 }

</bundles_post_ra>
